<compile_context>
chip_gen: v5e
topology: v5e:2x2
jax: 0.10.0
libtpu: 0.0.40
codegen_flags: <defaults>
</compile_context>

<pallas_src>
import functools
import math

import jax
import jax.numpy as jnp
from jax.experimental import pallas as pl
from jax.experimental.pallas import tpu as pltpu


def _layernorm(x, gamma, beta, eps=1e-5):
    mu = jnp.mean(x, axis=-1, keepdims=True)
    xc = x - mu
    var = jnp.mean(xc * xc, axis=-1, keepdims=True)
    return xc * jax.lax.rsqrt(var + eps) * gamma + beta


def adapter_kernel(seq_ref, text_ref, wq_ref, wkv_ref, wfc_ref, wff_ref, vecs_ref,
                   gcat_ref, rblk_ref, eblk_ref, esum_ref, sumb_ref,
                   out_ref, state_ref, *, num_layers, num_heads):
    layer = pl.program_id(1)
    Bt, D = out_ref.shape
    H = num_heads
    d_k = D // H
    scale = 1.0 / math.sqrt(d_k)

    # Load seq into the VMEM carry once per batch tile; updated every layer below.
    @pl.when(layer == 0)
    def _():
        state_ref[...] = seq_ref[...]

    x = state_ref[...]                                   # (Bt, D) f32 current seq activation
    text = text_ref[...]                                 # (Bt, D) f32

    vecs = vecs_ref[...]                                 # (9, D) packed per-layer vectors (f32)
    bq, bk, bv, bfc, bff = vecs[0:1], vecs[1:2], vecs[2:3], vecs[3:4], vecs[4:5]
    ln1_g, ln1_b, ln2_g, ln2_b = vecs[5:6], vecs[6:7], vecs[7:8], vecs[8:9]

    xb = x.astype(jnp.bfloat16)
    tb = text.astype(jnp.bfloat16)

    # Split projections: q from seq, fused [k|v] from text (no wasted columns).
    q = jnp.dot(xb, wq_ref[...], preferred_element_type=jnp.float32) + bq        # (Bt, D)
    kv = jnp.dot(tb, wkv_ref[...], preferred_element_type=jnp.float32)           # (Bt, 2D)
    k = kv[:, 0:D] + bk
    v = kv[:, D:2 * D] + bv

    # Broadcast every key/value head across all D lanes with ONE wide matmul each:
    #   kb_all[:, g*D + j] = k[:, g*d_k + (j % d_k)]
    kb_all = jnp.dot(k.astype(jnp.bfloat16), gcat_ref[...],
                     preferred_element_type=jnp.float32)                         # (Bt, H*D)
    vb_all = jnp.dot(v.astype(jnp.bfloat16), gcat_ref[...],
                     preferred_element_type=jnp.float32)                         # (Bt, H*D)

    # scores[:, g*H + h] = (q_head_h . k_head_g) / sqrt(d_k), all pairs in one matmul.
    q_rep = jnp.concatenate([q] * H, axis=-1)                                    # (Bt, H*D)
    qk = (q_rep * kb_all).astype(jnp.bfloat16)
    scores = jnp.dot(qk, rblk_ref[...], preferred_element_type=jnp.float32) * scale  # (Bt, H*H)

    # Softmax over key heads g (the row-global max is a valid stabiliser; kept in f32).
    m = jnp.max(scores, axis=-1, keepdims=True)
    exps = jnp.exp(scores - m)                                                   # (Bt, H*H)
    eb = exps.astype(jnp.bfloat16)
    p_exp = jnp.dot(eb, eblk_ref[...], preferred_element_type=jnp.float32)       # (Bt, H*D)
    denom = jnp.dot(eb, esum_ref[...], preferred_element_type=jnp.float32)       # (Bt, D)
    ctx_un = jnp.dot((p_exp * vb_all).astype(jnp.bfloat16), sumb_ref[...],
                     preferred_element_type=jnp.float32)                         # (Bt, D)
    ctx = ctx_un * pl.reciprocal(denom, approx=True)

    attn_out = jnp.dot(ctx.astype(jnp.bfloat16), wfc_ref[...],
                       preferred_element_type=jnp.float32) + bfc
    out1 = _layernorm(x + attn_out, ln1_g, ln1_b)
    ff = jnp.dot(out1.astype(jnp.bfloat16), wff_ref[...],
                 preferred_element_type=jnp.float32) + bff
    out2 = _layernorm(out1 + ff, ln2_g, ln2_b)

    # Carry updated seq to the next layer; write HBM output only once, at the last layer.
    state_ref[...] = out2

    @pl.when(layer == num_layers - 1)
    def _():
        out_ref[...] = out2.astype(out_ref.dtype)


def protein_adapter_v2(seq, text, wq, wkv, wfc, wff, vecs,
                       gcat, rblk, eblk, esum, sumb, *, num_heads, batch_tile=None):
    B, D = seq.shape
    L = wq.shape[0]
    H = num_heads
    bt = B if batch_tile is None else batch_tile
    assert B % bt == 0
    n_bt = B // bt

    kernel = functools.partial(adapter_kernel, num_layers=L, num_heads=H)

    # Advisory cost estimate so XLA schedules surrounding ops around the fused call.
    mm = (B * D * D + B * D * 2 * D + 2 * B * D * H * D + B * H * D * H * H
          + B * H * H * H * D + B * H * H * D + B * H * D * D + 2 * B * D * D)
    cost = pl.CostEstimate(
        flops=2 * L * mm,
        transcendentals=L * B * (H * H + D),
        bytes_accessed=(L * (3 * D * D + 2 * D * D) * 2 + L * 9 * D * 4
                        + (D * H * D + 2 * H * D * H * H + H * H * D + H * D * D) * 2
                        + 3 * B * D * 4),
    )

    return pl.pallas_call(
        kernel,
        out_shape=jax.ShapeDtypeStruct((B, D), jnp.float32),
        grid_spec=pltpu.PrefetchScalarGridSpec(
            num_scalar_prefetch=0,
            grid=(n_bt, L),
            in_specs=[
                pl.BlockSpec((bt, D), lambda b, l: (b, 0)),              # seq (init only)
                pl.BlockSpec((bt, D), lambda b, l: (b, 0)),              # text
                pl.BlockSpec((None, D, D), lambda b, l: (l, 0, 0)),      # Wq per layer (bf16)
                pl.BlockSpec((None, D, 2 * D), lambda b, l: (l, 0, 0)),  # [Wk|Wv] per layer (bf16)
                pl.BlockSpec((None, D, D), lambda b, l: (l, 0, 0)),      # Wfc per layer (bf16)
                pl.BlockSpec((None, D, D), lambda b, l: (l, 0, 0)),      # Wff per layer (bf16)
                pl.BlockSpec((None, 9, D), lambda b, l: (l, 0, 0)),      # packed bias/LN vectors
                pl.BlockSpec((D, H * D), lambda b, l: (0, 0)),           # G_cat (const, bf16)
                pl.BlockSpec((H * D, H * H), lambda b, l: (0, 0)),       # R_blk (const, bf16)
                pl.BlockSpec((H * H, H * D), lambda b, l: (0, 0)),       # E_blk (const, bf16)
                pl.BlockSpec((H * H, D), lambda b, l: (0, 0)),           # E_sum (const, bf16)
                pl.BlockSpec((H * D, D), lambda b, l: (0, 0)),           # Sum_blk (const, bf16)
            ],
            out_specs=pl.BlockSpec((bt, D), lambda b, l: (b, 0)),
            scratch_shapes=[pltpu.VMEM((bt, D), jnp.float32)],           # seq activation carry
        ),
        compiler_params=pltpu.CompilerParams(
            # Batch row-tiles are independent (megacore); layers are a serial carry.
            dimension_semantics=("parallel", "arbitrary"),
            vmem_limit_bytes=32 * 1024 * 1024,
        ),
        cost_estimate=cost,
    )(seq, text, wq, wkv, wfc, wff, vecs, gcat, rblk, eblk, esum, sumb)


# ---------------- constant attention indicator matrices (exact in bf16) ----------------
def make_attention_constants(d_model, num_heads, dtype=jnp.bfloat16):
    D, H = d_model, num_heads
    d_k = D // H
    lane = jnp.arange(D)
    head_of = lane // d_k                       # head owning lane j
    off_of = lane % d_k                         # within-head offset of lane j
    col = jnp.arange(H * D)
    g_of = col // D                             # key-head block g of broadcast column c
    off_c = col % d_k                           # within-head offset of broadcast column c
    sc = jnp.arange(H * H)
    g_of_s = sc // H                            # key head g of score column g*H + h
    h_of_s = sc % H                             # query head h of score column g*H + h

    # (x @ G_cat)[b, g*D + j] = x[b, g*d_k + (j % d_k)]
    gcat = ((head_of[:, None] == g_of[None, :]) &
            (off_of[:, None] == off_c[None, :])).astype(dtype)                   # (D, H*D)
    # R_blk[g*D + j, g'*H + h] = 1 iff g == g' and head(j) == h
    rblk = ((g_of[:, None] == g_of_s[None, :]) &
            (head_of[col % D][:, None] == h_of_s[None, :])).astype(dtype)        # (H*D, H*H)
    eblk = rblk.T                                                                # (H*H, H*D)
    # E_sum[g*H + h, j] = 1 iff head(j) == h  (per-lane softmax denominator)
    esum = (h_of_s[:, None] == head_of[None, :]).astype(dtype)                   # (H*H, D)
    # Sum_blk[g*D + j, j'] = 1 iff j == j'    (segment-sum over the H broadcast blocks)
    sumb = ((col % D)[:, None] == lane[None, :]).astype(dtype)                   # (H*D, D)
    return gcat, rblk, eblk, esum, sumb


# ---------------- pure-JAX f32 reference (for correctness check) ----------------
def _ref_layer(seq, text, p, num_heads):
    (wq, bq, wk, bk, wv, bv, wfc, bfc, g1, b1, wff, bff, g2, b2) = p
    B, D = seq.shape
    d_k = D // num_heads
    q = (seq @ wq + bq).reshape(B, num_heads, d_k)
    k = (text @ wk + bk).reshape(B, num_heads, d_k)
    v = (text @ wv + bv).reshape(B, num_heads, d_k)
    scores = jnp.einsum('bhd,bgd->bhg', q, k) / math.sqrt(d_k)
    attn = jax.nn.softmax(scores, axis=-1)
    out = jnp.einsum('bhg,bgd->bhd', attn, v).reshape(B, D)
    attn_output = out @ wfc + bfc
    out1 = _layernorm(seq + attn_output, g1, b1)
    ff = out1 @ wff + bff
    return _layernorm(out1 + ff, g2, b2)


def _ref_model(seq, text, layer_params, num_heads):
    for p in layer_params:
        seq = _ref_layer(seq, text, p, num_heads)
    return seq


# ---------------- deterministic parameter construction ----------------
def make_layer_params(key, d_model):
    keys = jax.random.split(key, 10)

    def lin(kw, kb):
        # Weight already transposed to (d_in, d_out); bias as (1, d_out).
        w_t = jax.random.normal(kw, (d_model, d_model), jnp.float32) * 0.05
        b = jax.random.normal(kb, (1, d_model), jnp.float32) * 0.02
        return w_t, b

    wq, bq = lin(keys[0], keys[1])
    wk, bk = lin(keys[2], keys[3])
    wv, bv = lin(keys[4], keys[5])
    wfc, bfc = lin(keys[6], keys[7])
    wff, bff = lin(keys[8], keys[9])
    g1 = jnp.ones((1, d_model), jnp.float32)
    b1 = jnp.zeros((1, d_model), jnp.float32)
    g2 = jnp.ones((1, d_model), jnp.float32)
    b2 = jnp.zeros((1, d_model), jnp.float32)
    return (wq, bq, wk, bk, wv, bv, wfc, bfc, g1, b1, wff, bff, g2, b2)


def pack_params(layer_params, weight_dtype=jnp.bfloat16):
    # Stack per-layer weights for the layer grid; weights stream as bf16, vectors stay f32.
    wq = jnp.stack([p[0] for p in layer_params]).astype(weight_dtype)
    wkv = jnp.stack([jnp.concatenate([p[2], p[4]], axis=1)
                     for p in layer_params]).astype(weight_dtype)
    wfc = jnp.stack([p[6] for p in layer_params]).astype(weight_dtype)
    wff = jnp.stack([p[10] for p in layer_params]).astype(weight_dtype)
    # Row order: [bq, bk, bv, bfc, bff, ln1_g, ln1_b, ln2_g, ln2_b]
    vecs = jnp.stack([
        jnp.concatenate([p[1], p[3], p[5], p[7], p[11], p[8], p[9], p[12], p[13]], axis=0)
        for p in layer_params
    ])
    return wq, wkv, wfc, wff, vecs


if __name__ == "__main__":
    B = 8
    D_MODEL = 32
    N_HEADS = 4
    N_LAYERS = 3

    root = jax.random.PRNGKey(0)
    k_seq, k_text, k_params = jax.random.split(root, 3)
    seq = jax.random.normal(k_seq, (B, D_MODEL), jnp.float32)
    text = jax.random.normal(k_text, (B, D_MODEL), jnp.float32)

    layer_keys = jax.random.split(k_params, N_LAYERS)
    layer_params = [make_layer_params(k, D_MODEL) for k in layer_keys]
    wq, wkv, wfc, wff, vecs = pack_params(layer_params)
    gcat, rblk, eblk, esum, sumb = make_attention_constants(D_MODEL, N_HEADS)

    run = jax.jit(functools.partial(protein_adapter_v2, num_heads=N_HEADS))
    out = run(seq, text, wq, wkv, wfc, wff, vecs, gcat, rblk, eblk, esum, sumb)
    out = jax.block_until_ready(out)

    ref = _ref_model(seq, text, layer_params, N_HEADS)
    assert out.shape == (B, D_MODEL)
    # bf16 weight streaming (per perf review) -> relaxed tolerance vs the f32 reference.
    assert jnp.allclose(out, ref, atol=2e-2, rtol=2e-2), "mismatch vs JAX reference"

    print("KERNEL_OK")
</pallas_src>

<mosaic_0001>
module attributes {stable_mosaic.version = 11 : i64} {
  func.func @adapter_kernel(%arg0: i32, %arg1: i32, %arg2: memref<8x32xf32, #tpu.memory_space<vmem>>, %arg3: memref<8x32xf32, #tpu.memory_space<vmem>>, %arg4: memref<1x32x32xbf16, #tpu.memory_space<vmem>>, %arg5: memref<1x32x64xbf16, #tpu.memory_space<vmem>>, %arg6: memref<1x32x32xbf16, #tpu.memory_space<vmem>>, %arg7: memref<1x32x32xbf16, #tpu.memory_space<vmem>>, %arg8: memref<1x9x32xf32, #tpu.memory_space<vmem>>, %arg9: memref<32x128xbf16, #tpu.memory_space<vmem>>, %arg10: memref<128x16xbf16, #tpu.memory_space<vmem>>, %arg11: memref<16x128xbf16, #tpu.memory_space<vmem>>, %arg12: memref<16x32xbf16, #tpu.memory_space<vmem>>, %arg13: memref<128x32xbf16, #tpu.memory_space<vmem>>, %arg14: memref<8x32xf32, #tpu.memory_space<vmem>>, %arg15: memref<8x32xf32, #tpu.memory_space<vmem>>) attributes {dimension_semantics = [#tpu.dimension_semantics<parallel>, #tpu.dimension_semantics<arbitrary>], iteration_bounds = array<i64: 1, 3>, scalar_prefetch = 0 : i64, scratch_operands = 1 : i64, tpu.core_type = #tpu.core_type<tc>, window_params = [{transform_indices = @transform_0, window_bounds = array<i64: 8, 32>}, {transform_indices = @transform_1, window_bounds = array<i64: 8, 32>}, {transform_indices = @transform_2, window_bounds = array<i64: 1, 32, 32>}, {transform_indices = @transform_3, window_bounds = array<i64: 1, 32, 64>}, {transform_indices = @transform_4, window_bounds = array<i64: 1, 32, 32>}, {transform_indices = @transform_5, window_bounds = array<i64: 1, 32, 32>}, {transform_indices = @transform_6, window_bounds = array<i64: 1, 9, 32>}, {pipeline_mode = #tpu.pipeline_mode<synchronous>, transform_indices = @transform_7, window_bounds = array<i64: 32, 128>}, {pipeline_mode = #tpu.pipeline_mode<synchronous>, transform_indices = @transform_8, window_bounds = array<i64: 128, 16>}, {pipeline_mode = #tpu.pipeline_mode<synchronous>, transform_indices = @transform_9, window_bounds = array<i64: 16, 128>}, {pipeline_mode = #tpu.pipeline_mode<synchronous>, transform_indices = @transform_10, window_bounds = array<i64: 16, 32>}, {pipeline_mode = #tpu.pipeline_mode<synchronous>, transform_indices = @transform_11, window_bounds = array<i64: 128, 32>}, {transform_indices = @transform_12, window_bounds = array<i64: 8, 32>}]} {
    %c0_i32 = arith.constant 0 : i32
    %0 = arith.cmpi eq, %arg1, %c0_i32 : i32
    %1 = arith.extui %0 : i1 to i32
    %c0_i32_0 = arith.constant 0 : i32
    %2 = arith.cmpi ne, %1, %c0_i32_0 : i32
    scf.if %2 {
      %c0_55 = arith.constant 0 : index
      %c0_56 = arith.constant 0 : index
      %119 = vector.load %arg2[%c0_55, %c0_56] : memref<8x32xf32, #tpu.memory_space<vmem>>, vector<8x32xf32>
      %c0_57 = arith.constant 0 : index
      %c0_58 = arith.constant 0 : index
      %120 = vector.load %arg15[%c0_57, %c0_58] : memref<8x32xf32, #tpu.memory_space<vmem>>, vector<8x32xf32>
      tpu.vector_store %arg15[%c0_57, %c0_58], %119 {strides = array<i32>} : memref<8x32xf32, #tpu.memory_space<vmem>>, vector<8x32xf32>,
    } else {
    }
    %c0 = arith.constant 0 : index
    %c0_1 = arith.constant 0 : index
    %3 = vector.load %arg15[%c0, %c0_1] : memref<8x32xf32, #tpu.memory_space<vmem>>, vector<8x32xf32>
    %c0_2 = arith.constant 0 : index
    %c0_3 = arith.constant 0 : index
    %4 = vector.load %arg3[%c0_2, %c0_3] : memref<8x32xf32, #tpu.memory_space<vmem>>, vector<8x32xf32>
    %c0_4 = arith.constant 0 : index
    %c0_5 = arith.constant 0 : index
    %c0_6 = arith.constant 0 : index
    %5 = vector.load %arg8[%c0_4, %c0_5, %c0_6] : memref<1x9x32xf32, #tpu.memory_space<vmem>>, vector<1x9x32xf32>
    %6 = vector.shape_cast %5 : vector<1x9x32xf32> to vector<9x32xf32>
    %7 = vector.extract_strided_slice %6 {offsets = [0, 0], sizes = [1, 32], strides = [1, 1]} : vector<9x32xf32> to vector<1x32xf32>
    %8 = vector.extract_strided_slice %6 {offsets = [1, 0], sizes = [1, 32], strides = [1, 1]} : vector<9x32xf32> to vector<1x32xf32>
    %9 = vector.extract_strided_slice %6 {offsets = [2, 0], sizes = [1, 32], strides = [1, 1]} : vector<9x32xf32> to vector<1x32xf32>
    %10 = vector.extract_strided_slice %6 {offsets = [3, 0], sizes = [1, 32], strides = [1, 1]} : vector<9x32xf32> to vector<1x32xf32>
    %11 = vector.extract_strided_slice %6 {offsets = [4, 0], sizes = [1, 32], strides = [1, 1]} : vector<9x32xf32> to vector<1x32xf32>
    %12 = vector.extract_strided_slice %6 {offsets = [5, 0], sizes = [1, 32], strides = [1, 1]} : vector<9x32xf32> to vector<1x32xf32>
    %13 = vector.extract_strided_slice %6 {offsets = [6, 0], sizes = [1, 32], strides = [1, 1]} : vector<9x32xf32> to vector<1x32xf32>
    %14 = vector.extract_strided_slice %6 {offsets = [7, 0], sizes = [1, 32], strides = [1, 1]} : vector<9x32xf32> to vector<1x32xf32>
    %15 = vector.extract_strided_slice %6 {offsets = [8, 0], sizes = [1, 32], strides = [1, 1]} : vector<9x32xf32> to vector<1x32xf32>
    %16 = arith.truncf %3 : vector<8x32xf32> to vector<8x32xbf16>
    %17 = arith.truncf %4 : vector<8x32xf32> to vector<8x32xbf16>
    %c0_7 = arith.constant 0 : index
    %c0_8 = arith.constant 0 : index
    %c0_9 = arith.constant 0 : index
    %18 = vector.load %arg4[%c0_7, %c0_8, %c0_9] : memref<1x32x32xbf16, #tpu.memory_space<vmem>>, vector<1x32x32xbf16>
    %19 = vector.shape_cast %18 : vector<1x32x32xbf16> to vector<32x32xbf16>
    %cst = arith.constant dense<0.000000e+00> : vector<8x32xf32>
    %20 = tpu.matmul %16, %19, %cst {dimension_numbers = #tpu.dot_dimension_numbers<[1], [0], [0], [1], [0, 0, 1, 1], [], []>} : vector<8x32xbf16>, vector<32x32xbf16>, vector<8x32xf32> -> vector<8x32xf32>
    %21 = vector.broadcast %7 : vector<1x32xf32> to vector<8x32xf32>
    %22 = arith.addf %20, %21 : vector<8x32xf32>
    %c0_10 = arith.constant 0 : index
    %c0_11 = arith.constant 0 : index
    %c0_12 = arith.constant 0 : index
    %23 = vector.load %arg5[%c0_10, %c0_11, %c0_12] : memref<1x32x64xbf16, #tpu.memory_space<vmem>>, vector<1x32x64xbf16>
    %24 = vector.shape_cast %23 : vector<1x32x64xbf16> to vector<32x64xbf16>
    %cst_13 = arith.constant dense<0.000000e+00> : vector<8x64xf32>
    %25 = tpu.matmul %17, %24, %cst_13 {dimension_numbers = #tpu.dot_dimension_numbers<[1], [0], [0], [1], [0, 0, 1, 1], [], []>} : vector<8x32xbf16>, vector<32x64xbf16>, vector<8x64xf32> -> vector<8x64xf32>
    %26 = vector.extract_strided_slice %25 {offsets = [0, 0], sizes = [8, 32], strides = [1, 1]} : vector<8x64xf32> to vector<8x32xf32>
    %27 = vector.broadcast %8 : vector<1x32xf32> to vector<8x32xf32>
    %28 = arith.addf %26, %27 : vector<8x32xf32>
    %29 = vector.extract_strided_slice %25 {offsets = [0, 32], sizes = [8, 32], strides = [1, 1]} : vector<8x64xf32> to vector<8x32xf32>
    %30 = vector.broadcast %9 : vector<1x32xf32> to vector<8x32xf32>
    %31 = arith.addf %29, %30 : vector<8x32xf32>
    %32 = arith.truncf %28 : vector<8x32xf32> to vector<8x32xbf16>
    %c0_14 = arith.constant 0 : index
    %c0_15 = arith.constant 0 : index
    %33 = vector.load %arg9[%c0_14, %c0_15] : memref<32x128xbf16, #tpu.memory_space<vmem>>, vector<32x128xbf16>
    %cst_16 = arith.constant dense<0.000000e+00> : vector<8x128xf32>
    %34 = tpu.matmul %32, %33, %cst_16 {dimension_numbers = #tpu.dot_dimension_numbers<[1], [0], [0], [1], [0, 0, 1, 1], [], []>} : vector<8x32xbf16>, vector<32x128xbf16>, vector<8x128xf32> -> vector<8x128xf32>
    %35 = arith.truncf %31 : vector<8x32xf32> to vector<8x32xbf16>
    %c0_17 = arith.constant 0 : index
    %c0_18 = arith.constant 0 : index
    %36 = vector.load %arg9[%c0_17, %c0_18] : memref<32x128xbf16, #tpu.memory_space<vmem>>, vector<32x128xbf16>
    %cst_19 = arith.constant dense<0.000000e+00> : vector<8x128xf32>
    %37 = tpu.matmul %35, %36, %cst_19 {dimension_numbers = #tpu.dot_dimension_numbers<[1], [0], [0], [1], [0, 0, 1, 1], [], []>} : vector<8x32xbf16>, vector<32x128xbf16>, vector<8x128xf32> -> vector<8x128xf32>
    %38 = tpu.concatenate %22, %22, %22, %22 in 1 : vector<8x32xf32>, vector<8x32xf32>, vector<8x32xf32>, vector<8x32xf32> -> vector<8x128xf32>
    %39 = arith.mulf %38, %34 : vector<8x128xf32>
    %40 = arith.truncf %39 : vector<8x128xf32> to vector<8x128xbf16>
    %c0_20 = arith.constant 0 : index
    %c0_21 = arith.constant 0 : index
    %41 = vector.load %arg10[%c0_20, %c0_21] : memref<128x16xbf16, #tpu.memory_space<vmem>>, vector<128x16xbf16>
    %cst_22 = arith.constant dense<0.000000e+00> : vector<8x16xf32>
    %42 = tpu.matmul %40, %41, %cst_22 {dimension_numbers = #tpu.dot_dimension_numbers<[1], [0], [0], [1], [0, 0, 1, 1], [], []>} : vector<8x128xbf16>, vector<128x16xbf16>, vector<8x16xf32> -> vector<8x16xf32>
    %cst_23 = arith.constant 0.353553385 : f32
    %43 = vector.broadcast %cst_23 : f32 to vector<8x16xf32>
    %44 = arith.mulf %42, %43 : vector<8x16xf32>
    %cst_24 = arith.constant dense<0xFF800000> : vector<8xf32>
    %45 = vector.multi_reduction <maximumf>, %44, %cst_24 [1] : vector<8x16xf32> to vector<8xf32>
    %46 = vector.shape_cast %45 : vector<8xf32> to vector<8x1xf32>
    %47 = vector.broadcast %46 : vector<8x1xf32> to vector<8x16xf32>
    %48 = arith.subf %44, %47 : vector<8x16xf32>
    %49 = math.exp %48 : vector<8x16xf32>
    %50 = arith.truncf %49 : vector<8x16xf32> to vector<8x16xbf16>
    %c0_25 = arith.constant 0 : index
    %c0_26 = arith.constant 0 : index
    %51 = vector.load %arg11[%c0_25, %c0_26] : memref<16x128xbf16, #tpu.memory_space<vmem>>, vector<16x128xbf16>
    %cst_27 = arith.constant dense<0.000000e+00> : vector<8x128xf32>
    %52 = tpu.matmul %50, %51, %cst_27 {dimension_numbers = #tpu.dot_dimension_numbers<[1], [0], [0], [1], [0, 0, 1, 1], [], []>} : vector<8x16xbf16>, vector<16x128xbf16>, vector<8x128xf32> -> vector<8x128xf32>
    %c0_28 = arith.constant 0 : index
    %c0_29 = arith.constant 0 : index
    %53 = vector.load %arg12[%c0_28, %c0_29] : memref<16x32xbf16, #tpu.memory_space<vmem>>, vector<16x32xbf16>
    %cst_30 = arith.constant dense<0.000000e+00> : vector<8x32xf32>
    %54 = tpu.matmul %50, %53, %cst_30 {dimension_numbers = #tpu.dot_dimension_numbers<[1], [0], [0], [1], [0, 0, 1, 1], [], []>} : vector<8x16xbf16>, vector<16x32xbf16>, vector<8x32xf32> -> vector<8x32xf32>
    %55 = arith.mulf %52, %37 : vector<8x128xf32>
    %56 = arith.truncf %55 : vector<8x128xf32> to vector<8x128xbf16>
    %c0_31 = arith.constant 0 : index
    %c0_32 = arith.constant 0 : index
    %57 = vector.load %arg13[%c0_31, %c0_32] : memref<128x32xbf16, #tpu.memory_space<vmem>>, vector<128x32xbf16>
    %cst_33 = arith.constant dense<0.000000e+00> : vector<8x32xf32>
    %58 = tpu.matmul %56, %57, %cst_33 {dimension_numbers = #tpu.dot_dimension_numbers<[1], [0], [0], [1], [0, 0, 1, 1], [], []>} : vector<8x128xbf16>, vector<128x32xbf16>, vector<8x32xf32> -> vector<8x32xf32>
    %59 = tpu.reciprocal %54 {approx = true} : vector<8x32xf32> -> vector<8x32xf32>
    %60 = arith.mulf %58, %59 : vector<8x32xf32>
    %61 = arith.truncf %60 : vector<8x32xf32> to vector<8x32xbf16>
    %c0_34 = arith.constant 0 : index
    %c0_35 = arith.constant 0 : index
    %c0_36 = arith.constant 0 : index
    %62 = vector.load %arg6[%c0_34, %c0_35, %c0_36] : memref<1x32x32xbf16, #tpu.memory_space<vmem>>, vector<1x32x32xbf16>
    %63 = vector.shape_cast %62 : vector<1x32x32xbf16> to vector<32x32xbf16>
    %cst_37 = arith.constant dense<0.000000e+00> : vector<8x32xf32>
    %64 = tpu.matmul %61, %63, %cst_37 {dimension_numbers = #tpu.dot_dimension_numbers<[1], [0], [0], [1], [0, 0, 1, 1], [], []>} : vector<8x32xbf16>, vector<32x32xbf16>, vector<8x32xf32> -> vector<8x32xf32>
    %65 = vector.broadcast %10 : vector<1x32xf32> to vector<8x32xf32>
    %66 = arith.addf %64, %65 : vector<8x32xf32>
    %67 = arith.addf %3, %66 : vector<8x32xf32>
    %cst_38 = arith.constant dense<0.000000e+00> : vector<8xf32>
    %68 = vector.multi_reduction <add>, %67, %cst_38 [1] : vector<8x32xf32> to vector<8xf32>
    %69 = vector.shape_cast %68 : vector<8xf32> to vector<8x1xf32>
    %cst_39 = arith.constant 3.200000e+01 : f32
    %70 = vector.broadcast %cst_39 : f32 to vector<8x1xf32>
    %71 = arith.divf %69, %70 : vector<8x1xf32>
    %72 = vector.broadcast %71 : vector<8x1xf32> to vector<8x32xf32>
    %73 = arith.subf %67, %72 : vector<8x32xf32>
    %74 = arith.mulf %73, %73 : vector<8x32xf32>
    %cst_40 = arith.constant dense<0.000000e+00> : vector<8xf32>
    %75 = vector.multi_reduction <add>, %74, %cst_40 [1] : vector<8x32xf32> to vector<8xf32>
    %76 = vector.shape_cast %75 : vector<8xf32> to vector<8x1xf32>
    %cst_41 = arith.constant 3.200000e+01 : f32
    %77 = vector.broadcast %cst_41 : f32 to vector<8x1xf32>
    %78 = arith.divf %76, %77 : vector<8x1xf32>
    %cst_42 = arith.constant 9.99999974E-6 : f32
    %79 = vector.broadcast %cst_42 : f32 to vector<8x1xf32>
    %80 = arith.addf %78, %79 : vector<8x1xf32>
    %81 = math.rsqrt %80 : vector<8x1xf32>
    %82 = vector.broadcast %81 : vector<8x1xf32> to vector<8x32xf32>
    %83 = arith.mulf %73, %82 : vector<8x32xf32>
    %84 = vector.broadcast %12 : vector<1x32xf32> to vector<8x32xf32>
    %85 = arith.mulf %83, %84 : vector<8x32xf32>
    %86 = vector.broadcast %13 : vector<1x32xf32> to vector<8x32xf32>
    %87 = arith.addf %85, %86 : vector<8x32xf32>
    %88 = arith.truncf %87 : vector<8x32xf32> to vector<8x32xbf16>
    %c0_43 = arith.constant 0 : index
    %c0_44 = arith.constant 0 : index
    %c0_45 = arith.constant 0 : index
    %89 = vector.load %arg7[%c0_43, %c0_44, %c0_45] : memref<1x32x32xbf16, #tpu.memory_space<vmem>>, vector<1x32x32xbf16>
    %90 = vector.shape_cast %89 : vector<1x32x32xbf16> to vector<32x32xbf16>
    %cst_46 = arith.constant dense<0.000000e+00> : vector<8x32xf32>
    %91 = tpu.matmul %88, %90, %cst_46 {dimension_numbers = #tpu.dot_dimension_numbers<[1], [0], [0], [1], [0, 0, 1, 1], [], []>} : vector<8x32xbf16>, vector<32x32xbf16>, vector<8x32xf32> -> vector<8x32xf32>
    %92 = vector.broadcast %11 : vector<1x32xf32> to vector<8x32xf32>
    %93 = arith.addf %91, %92 : vector<8x32xf32>
    %94 = arith.addf %87, %93 : vector<8x32xf32>
    %cst_47 = arith.constant dense<0.000000e+00> : vector<8xf32>
    %95 = vector.multi_reduction <add>, %94, %cst_47 [1] : vector<8x32xf32> to vector<8xf32>
    %96 = vector.shape_cast %95 : vector<8xf32> to vector<8x1xf32>
    %cst_48 = arith.constant 3.200000e+01 : f32
    %97 = vector.broadcast %cst_48 : f32 to vector<8x1xf32>
    %98 = arith.divf %96, %97 : vector<8x1xf32>
    %99 = vector.broadcast %98 : vector<8x1xf32> to vector<8x32xf32>
    %100 = arith.subf %94, %99 : vector<8x32xf32>
    %101 = arith.mulf %100, %100 : vector<8x32xf32>
    %cst_49 = arith.constant dense<0.000000e+00> : vector<8xf32>
    %102 = vector.multi_reduction <add>, %101, %cst_49 [1] : vector<8x32xf32> to vector<8xf32>
    %103 = vector.shape_cast %102 : vector<8xf32> to vector<8x1xf32>
    %cst_50 = arith.constant 3.200000e+01 : f32
    %104 = vector.broadcast %cst_50 : f32 to vector<8x1xf32>
    %105 = arith.divf %103, %104 : vector<8x1xf32>
    %cst_51 = arith.constant 9.99999974E-6 : f32
    %106 = vector.broadcast %cst_51 : f32 to vector<8x1xf32>
    %107 = arith.addf %105, %106 : vector<8x1xf32>
    %108 = math.rsqrt %107 : vector<8x1xf32>
    %109 = vector.broadcast %108 : vector<8x1xf32> to vector<8x32xf32>
    %110 = arith.mulf %100, %109 : vector<8x32xf32>
    %111 = vector.broadcast %14 : vector<1x32xf32> to vector<8x32xf32>
    %112 = arith.mulf %110, %111 : vector<8x32xf32>
    %113 = vector.broadcast %15 : vector<1x32xf32> to vector<8x32xf32>
    %114 = arith.addf %112, %113 : vector<8x32xf32>
    %c0_52 = arith.constant 0 : index
    %c0_53 = arith.constant 0 : index
    %115 = vector.load %arg15[%c0_52, %c0_53] : memref<8x32xf32, #tpu.memory_space<vmem>>, vector<8x32xf32>
    tpu.vector_store %arg15[%c0_52, %c0_53], %114 {strides = array<i32>} : memref<8x32xf32, #tpu.memory_space<vmem>>, vector<8x32xf32>,
    %c2_i32 = arith.constant 2 : i32
    %116 = arith.cmpi eq, %arg1, %c2_i32 : i32
    %117 = arith.extui %116 : i1 to i32
    %c0_i32_54 = arith.constant 0 : i32
    %118 = arith.cmpi ne, %117, %c0_i32_54 : i32
    scf.if %118 {
      %c0_55 = arith.constant 0 : index
      %c0_56 = arith.constant 0 : index
      %119 = vector.load %arg14[%c0_55, %c0_56] : memref<8x32xf32, #tpu.memory_space<vmem>>, vector<8x32xf32>
      tpu.vector_store %arg14[%c0_55, %c0_56], %114 {strides = array<i32>} : memref<8x32xf32, #tpu.memory_space<vmem>>, vector<8x32xf32>,
    } else {
    }
    return
  }
  func.func @transform_0(%arg0: i32, %arg1: i32) -> (i32, i32) {
    %c0_i32 = arith.constant 0 : i32
    %c0_i32_0 = arith.constant 0 : i32
    return %arg0, %c0_i32 : i32, i32
  }
  func.func @transform_1(%arg0: i32, %arg1: i32) -> (i32, i32) {
    %c0_i32 = arith.constant 0 : i32
    %c0_i32_0 = arith.constant 0 : i32
    return %arg0, %c0_i32 : i32, i32
  }
  func.func @transform_2(%arg0: i32, %arg1: i32) -> (i32, i32, i32) {
    %c0_i32 = arith.constant 0 : i32
    %c0_i32_0 = arith.constant 0 : i32
    %c0_i32_1 = arith.constant 0 : i32
    return %arg1, %c0_i32, %c0_i32_0 : i32, i32, i32
  }
  func.func @transform_3(%arg0: i32, %arg1: i32) -> (i32, i32, i32) {
    %c0_i32 = arith.constant 0 : i32
    %c0_i32_0 = arith.constant 0 : i32
    %c0_i32_1 = arith.constant 0 : i32
    return %arg1, %c0_i32, %c0_i32_0 : i32, i32, i32
  }
  func.func @transform_4(%arg0: i32, %arg1: i32) -> (i32, i32, i32) {
    %c0_i32 = arith.constant 0 : i32
    %c0_i32_0 = arith.constant 0 : i32
    %c0_i32_1 = arith.constant 0 : i32
    return %arg1, %c0_i32, %c0_i32_0 : i32, i32, i32
  }
  func.func @transform_5(%arg0: i32, %arg1: i32) -> (i32, i32, i32) {
    %c0_i32 = arith.constant 0 : i32
    %c0_i32_0 = arith.constant 0 : i32
    %c0_i32_1 = arith.constant 0 : i32
    return %arg1, %c0_i32, %c0_i32_0 : i32, i32, i32
  }
  func.func @transform_6(%arg0: i32, %arg1: i32) -> (i32, i32, i32) {
    %c0_i32 = arith.constant 0 : i32
    %c0_i32_0 = arith.constant 0 : i32
    %c0_i32_1 = arith.constant 0 : i32
    return %arg1, %c0_i32, %c0_i32_0 : i32, i32, i32
  }
  func.func @transform_7(%arg0: i32, %arg1: i32) -> (i32, i32) {
    %c0_i32 = arith.constant 0 : i32
    %c0_i32_0 = arith.constant 0 : i32
    %c0_i32_1 = arith.constant 0 : i32
    return %c0_i32, %c0_i32_0 : i32, i32
  }
  func.func @transform_8(%arg0: i32, %arg1: i32) -> (i32, i32) {
    %c0_i32 = arith.constant 0 : i32
    %c0_i32_0 = arith.constant 0 : i32
    %c0_i32_1 = arith.constant 0 : i32
    return %c0_i32, %c0_i32_0 : i32, i32
  }
  func.func @transform_9(%arg0: i32, %arg1: i32) -> (i32, i32) {
    %c0_i32 = arith.constant 0 : i32
    %c0_i32_0 = arith.constant 0 : i32
    %c0_i32_1 = arith.constant 0 : i32
    return %c0_i32, %c0_i32_0 : i32, i32
  }
  func.func @transform_10(%arg0: i32, %arg1: i32) -> (i32, i32) {
    %c0_i32 = arith.constant 0 : i32
    %c0_i32_0 = arith.constant 0 : i32
    %c0_i32_1 = arith.constant 0 : i32
    return %c0_i32, %c0_i32_0 : i32, i32
  }
  func.func @transform_11(%arg0: i32, %arg1: i32) -> (i32, i32) {
    %c0_i32 = arith.constant 0 : i32
    %c0_i32_0 = arith.constant 0 : i32
    %c0_i32_1 = arith.constant 0 : i32
    return %c0_i32, %c0_i32_0 : i32, i32
  }
  func.func @transform_12(%arg0: i32, %arg1: i32) -> (i32, i32) {
    %c0_i32 = arith.constant 0 : i32
    %c0_i32_0 = arith.constant 0 : i32
    return %arg0, %c0_i32 : i32, i32
  }
}

</mosaic_0001>

<bundles_post_ra>
// kernel: protein_adapter_v2.1
= control target key start
LH: loop header
LB: loop body
LE: loop exit
PB: predicated region body
PF: predicated region fallthrough
CT: control target
= control target key end

     0   :  { %s1892_s0 = inlined_call_operand.hbm [shape: f32[8,32], index: 0, kind: input, shape index: {}]   ;;  %s1893_s1 = inlined_call_operand.hbm [shape: f32[8,32], index: 1, kind: input, shape index: {}]   ;;  %s1894_s2 = inlined_call_operand.vmem [shape: bf16[3,32,32], index: 2, kind: input, shape index: {}]   ;;  %s1895_s3 = inlined_call_operand.vmem [shape: bf16[3,32,64], index: 3, kind: input, shape index: {}]   ;;  %s1896_s4 = inlined_call_operand.vmem [shape: bf16[3,32,32], index: 4, kind: input, shape index: {}]   ;;  %s1897_s5 = inlined_call_operand.vmem [shape: bf16[3,32,32], index: 5, kind: input, shape index: {}]   ;;  %s1898_s6 = inlined_call_operand.vmem [shape: f32[3,9,32], index: 6, kind: input, shape index: {}]   ;;  %s1899_s7 = inlined_call_operand.vmem [shape: bf16[32,128], index: 7, kind: input, shape index: {}]   ;;  %s1900_s8 = inlined_call_operand.vmem [shape: bf16[128,16], index: 8, kind: input, shape index: {}]   ;;  %s1901_s9 = inlined_call_operand.vmem [shape: bf16[16,128], index: 9, kind: input, shape index: {}]   ;;  %s1902_s10 = inlined_call_operand.hbm [shape: bf16[16,32], index: 10, kind: input, shape index: {}]   ;;  %s1903_s11 = inlined_call_operand.vmem [shape: bf16[128,32], index: 11, kind: input, shape index: {}]   ;;  %s1904_s12 = inlined_call_operand.hbm [shape: f32[8,32], index: 12, kind: output, shape index: {}]  }
   0x1   :  { %1906 = sst [smem:[#allocation13_spill]] %s1892_s0 }
   0x2   :  { %1907 = sst [smem:[#allocation14_spill]] %s1893_s1 }
   0x3   :  { %17 = vsyncpa [#allocation4], 0 }
   0x4   :  { %18 = vsyncpa [#allocation7], 0 }
   0x5   :  { %19 = vsyncpa [#allocation5], 0  ;;  %s1693_s21 = smov 0   ;;  %s1695_s22 = smov 0  }
   0x6   :  { %s1697_s23 = smov 0  }
   0x7 LB: > { %s1908_s1 = sld [smem:[#allocation14_spill]]  ;;  %s1905_s27 = sadd.s32 4294967295, %s1616_s23   ;;  %s1616_s23 = sphi %s1697_s23, %s25_s23   ;;  %s1612_s22 = sphi %s1695_s22, %s1915_s22   ;;  %s1608_s21 = sphi %s1693_s21, %s1914_s21  }
   0x8   : > { %p1207_p0 = scmp.ge.s32.totalorder %s1616_s23, 1  ;;  %p355_p1 = scmp.lt.s32.totalorder %s1616_s23, 4 }
   0x9   : > { %p1716_p2 = scmp.eq.s32.totalorder %s1905_s27, 0  ;;  %s1618_s30 = smov [#allocation6]  }
   0xa   : > { %p1720_p3 = pnand %p1207_p0, %p355_p1  ;;  %s385_s13 = sshll.u32 %s1618_s30, 4  ;;  %s386_s13 = int_to_ptr.vmem [resolvable:$true] %s385_s13 }
   0xb   : > { %s34_s15 = sadd.s32 1, %s1612_s22  ;;  %s1912_s0 = sld [smem:[#allocation13_spill]] }
   0xc   : > { %p1401_p4 = pneg %p1720_p3  ;;  %p35_p6 = scmp.ge.s32.totalorder %s34_s15, 3 }
   0xd   : > { %s383_s26 = sshll.u32 %s1908_s1, 4  ;;  %s403_s24 = sshll.u32 %s1902_s10, 4  ;;  %s384_s26 = int_to_ptr.hbm [resolvable:$true] %s383_s26  ;;  %s404_s24 = int_to_ptr.hbm [resolvable:$true] %s403_s24 }
   0xe   : > { %p1728_p5 = pnand %p1716_p2, %p1401_p4  ;;  %s1917_s15 = smov (%p35_p6, %s34_s15), 0 }
   0xf   : > { %s1619_s25 = smov [#allocation3]   ;;  %s1620_s27 = smov [#allocation8]  }
  0x10   : > { %1407 = dma.hbm_to_vmem [thread:$0]  (!%p1728_p5), %s384_s26, 128, %s386_s13, [#allocation7]  }
  0x11   : > { %s369_s18 = sshll.u32 %s1912_s0, 4  ;;  %s371_s30 = sshll.u32 %s1619_s25, 4  ;;  %s370_s18 = int_to_ptr.hbm [resolvable:$true] %s369_s18  ;;  %s372_s30 = int_to_ptr.vmem [resolvable:$true] %s371_s30 }
  0x12   : > { %1404 = dma.hbm_to_vmem [thread:$0]  (!%p1728_p5), %s370_s18, 128, %s372_s30, [#allocation4]  }
  0x13   : > { %s405_s1 = sshll.u32 %s1620_s27, 4  ;;  %s1621_s16 = smov 64   ;;  %s406_s1 = int_to_ptr.vmem [resolvable:$true] %s405_s1 }
  0x14   : > { %s1622_s17 = smov 4   ;;  %464 = sbr.rel (%p1720_p3) target bundleno = 1650 (0x672), region = 68 }
  0x15   : > { %1410 = dma.hbm_to_vmem [thread:$0]  (!%p1728_p5), %s404_s24, 128, %s406_s1, [#allocation7], %s1621_s16, %s1621_s16, %s1622_s17  }
  0x19   : > { %1595 = dma.done.wait (%p1716_p2), [#allocation4], 128  }
  0x1a   : > { %1597 = vsyncadd (%p1716_p2), [#allocation4], 4294967168 }
  0x1b   : > { %1599 = dma.done.wait (%p1716_p2), [#allocation7], 256  }
  0x1c   : > { %1601 = vsyncadd (%p1716_p2), [#allocation7], 4294967040  ;;  %p532_p7 = scmp.lt.s32.totalorder %s1608_s21, 2  ;;  %p1226_p8 = scmp.ne.s32.totalorder %s1608_s21, 0 }
  0x1e   : > { %s533_s26 = scalar_select %p532_p7, %s1608_s21, 2 }
  0x1f   : > { %561 = sbr.rel (%p1226_p8) target bundleno = 38 (0x26), region = 84 }
  0x20   : > { %s1352_s1 = sshll.u32 %s533_s26, 4 }
  0x21   : > { %s536_s13 = scalar_lea.vmem %s1894_s2, %s1352_s1  ;;  %s541_s19 = scalar_lea.vmem %s1895_s3, %s1352_s1 }
  0x22   : > { %s1768_s25 = scalar_lea.vmem %s1896_s4, %s1352_s1  ;;  %s1773_s16 = scalar_lea.vmem %s1897_s5, %s1352_s1 }
  0x23   : > { %s1778_s0 = scalar_lea.vmem %s1898_s6, %s1352_s1 }
  0x24   : > { %v562_v0 = vld [vmem:[#allocation3] sm:$0xff]  ;;  %vm563_vm0 = vcmask 261120  }
  0x25   : > { %564 = vst.msk [vmem:[#allocation2] sm:$0xff] %vm563_vm0, %v562_v0 }
  0x26 PF: > { %v1358_v1 = vld [vmem:[%s536_s13 + $0x8] sm:$0xff]  ;;  %v1357_v3 = vld [vmem:[%s536_s13] sm:$0xff]  ;;  %v566_v6 = vld [vmem:[#allocation6] sm:$0xff]  ;;  %vm588_vm1 = vcmask 261120   ;;  %s1623_s24 = smov 96   ;;  %s1624_s28 = smov 32  }
  0x27   : > { %v1360_v2 = vld [vmem:[%s541_s19 + $0x8] sm:$0xff]  ;;  %v1359_v4 = vld [vmem:[%s541_s19] sm:$0xff]  ;;  %598 = vmatpush.bf16.msra.mxu0 %v1358_v1  ;;  %v570_v9 = vpack.c.bf16 %v566_v6, %v566_v6  ;;  %v1370_v11 = vld [vmem:[%s1900_s8 + $0x38] sm:$0xff]  ;;  %s1625_s30 = smov 64   ;;  %vm709_vm2 = vcmask 523264   ;;  %vm711_vm3 = vcmask 785408  }
  0x28   : > { %630 = vmatpush.bf16.msra.mxu1 %v1360_v2  ;;  %v1362_v7 = vld [vmem:[%s1899_s7 + $0x8] sm:$0xff]  ;;  %v1361_v10 = vld [vmem:[%s1899_s7] sm:$0xff]  ;;  %v1369_v12 = vld [vmem:[%s1900_s8 + $0x30] sm:$0xff]  ;;  %vm793_vm4 = vcmask 130048   ;;  %p1347_p9 = scmp.ne.s32.totalorder %s1608_s21, 2 }
  0x29   : > { %671 = vmatpush.bf16.msra.mxu2 %v1362_v7  ;;  %691 = vmatpush.bf16.msra.mxu3 %v1362_v7  ;;  %v1800_v13 = vld [vmem:[%s1778_s0] sm:$0xff]  ;;  %v1368_v24 = vld [vmem:[%s1900_s8 + $0x28] sm:$0xff]  ;;  %v1366_v26 = vld [vmem:[%s1900_s8 + $0x18] sm:$0xff] }
  0x2a   : > { %v575_v14 = vperm.slane %v1800_v13, 0  ;;  %v637_v15 = vperm.slane %v1800_v13, 1  ;;  %v639_v21 = vperm.slane %v1800_v13, 2  ;;  %v1367_v25 = vld [vmem:[%s1900_s8 + $0x20] sm:$0xff]  ;;  %v1365_v27 = vld [vmem:[%s1900_s8 + $0x10] sm:$0xff]  ;;  %v1364_v28 = vld [vmem:[%s1900_s8 + $0x8] sm:$0xff] }
  0x2b   : > { %599 = vmatpush.bf16.msra.mxu0 %v1357_v3  ;;  %v1363_v29 = vld [vmem:[%s1900_s8] sm:$0xff]  ;;  %v1372_v48 = vld [vmem:[#allocation8] sm:$0xff]  ;;  %v1379_v50 = vld [vmem:[%s1903_s11 + $0x30] sm:$0xff] }
  0x2c   : > { %v1781_v5 = vld [vmem:[#allocation2] sm:$0xff]  ;;  %631 = vmatpush.bf16.msra.mxu1 %v1359_v4  ;;  %v1380_v49 = vld [vmem:[%s1903_s11 + $0x38] sm:$0xff]  ;;  %v1378_v51 = vld [vmem:[%s1903_s11 + $0x28] sm:$0xff] }
  0x2d   : > { %v569_v8 = vpack.c.bf16 %v1781_v5, %v1781_v5  ;;  %672 = vmatpush.bf16.msra.mxu2 %v1361_v10  ;;  %692 = vmatpush.bf16.msra.mxu3 %v1361_v10  ;;  %v1371_v40 = vld [vmem:[%s1901_s9] sm:$0xff]  ;;  %v1376_v53 = vld [vmem:[%s1903_s11 + $0x18] sm:$0xff]  ;;  %v1375_v55 = vld [vmem:[%s1903_s11 + $0x10] sm:$0xff] }
  0x2e   : > { %v1377_v52 = vld [vmem:[%s1903_s11 + $0x20] sm:$0xff]  ;;  %v1374_v58 = vld [vmem:[%s1903_s11 + $0x8] sm:$0xff] }
  0x2f   : > { %1235 = vmatmul.msk.bf16.vlgmr.msra.gmra.mxu0 %vm588_vm1, %v569_v8  ;;  %1244 = vmatmul.msk.bf16.vlgmr.msra.gmra.mxu1 %vm588_vm1, %v570_v9  ;;  %v1373_v62 = vld [vmem:[%s1903_s11] sm:$0xff]  ;;  %v1382_v63 = vld [vmem:[%s1768_s25 + $0x8] sm:$0xff] }
  0x30   : > { %779 = vmatpush.bf16.msrb.mxu0 %v1370_v11  ;;  %819 = vmatpush.bf16.msrb.mxu1 %v1371_v40  ;;  %v1381_v0 = vld [vmem:[%s1768_s25] sm:$0xff] }
  0x31   : > { %840 = vmatpush.bf16.msrb.mxu2 %v1372_v48  ;;  %912 = vmatpush.bf16.msrb.mxu3 %v1380_v49 }
  0x34   : > { %780 = vmatpush.bf16.msrb.mxu0 %v1369_v12  ;;  %954 = vmatpush.bf16.msra.mxu1 %v1382_v63 }
  0x35   : > { %913 = vmatpush.bf16.msrb.mxu3 %v1379_v50 }
  0x38   : > { %781 = vmatpush.bf16.msrb.mxu0 %v1368_v24  ;;  %955 = vmatpush.bf16.msra.mxu1 %v1381_v0 }
  0x39   : > { %914 = vmatpush.bf16.msrb.mxu3 %v1378_v51  ;;  %v1000_v51 = vperm.slane %v1800_v13, 4 }
  0x3c   : > { %782 = vmatpush.bf16.msrb.mxu0 %v1367_v25 }
  0x3d   : > { %915 = vmatpush.bf16.msrb.mxu3 %v1377_v52 }
  0x40   : > { %783 = vmatpush.bf16.msrb.mxu0 %v1366_v26 }
  0x41   : > { %916 = vmatpush.bf16.msrb.mxu3 %v1376_v53 }
  0x44   : > { %784 = vmatpush.bf16.msrb.mxu0 %v1365_v27 }
  0x45   : > { %917 = vmatpush.bf16.msrb.mxu3 %v1375_v55 }
  0x48   : > { %785 = vmatpush.bf16.msrb.mxu0 %v1364_v28 }
  0x49   : > { %918 = vmatpush.bf16.msrb.mxu3 %v1374_v58 }
  0x4c   : > { %786 = vmatpush.bf16.msrb.mxu0 %v1363_v29 }
  0x4d   : > { %919 = vmatpush.bf16.msrb.mxu3 %v1373_v62 }
  0xac   : > { %v601_v16 = vpop.f32.mrf.mxu0  ;;  %v633_v17 = vpop.f32.mrf.mxu1 }
  0xad   : > { %v602_v18 = vadd.f32 %v601_v16, %v575_v14  ;;  %v638_v19 = vadd.f32 %v637_v15, %v633_v17  ;;  %v932_v16 = vperm.slane %v1800_v13, 3 }
  0xaf   : > { %v645_v20 = vpack.c.bf16 %v638_v19, %v638_v19  ;;  %705 = vrot.lane.b32.xlu1 %v602_v18, %s1623_s24  ;;  %699 = vrot.lane.b32.xlu0 %v602_v18, %s1624_s28 }
  0xb1   : > { %1253 = vmatmul.msk.bf16.vlgmr.msra.gmra.mxu2 %vm588_vm1, %v645_v20 }
  0xb4   : > { %v635_v22 = vpop.f32.mrf.mxu1  ;;  %v603_v23 = vpop.f32.mrf.mxu0 }
  0xb5   : > { %v1626_v22 = vmov 32.0  }
  0xb7   : > { %641 = vrot.lane.b32.xlu1 %v639_v21, %s1624_s28  ;;  %702 = vrot.lane.b32.xlu0 %v602_v18, %s1625_s30 }
 0x121   : > { %v700_v30 = vpop.permute.xlu0 %699  ;;  %v706_v34 = vpop.permute.xlu1 %705 }
 0x122   : > { %v708_v32 = vsel %vm588_vm1, %v602_v18, %v700_v30 }
 0x129   : > { %v703_v31 = vpop.permute.xlu0 %702  ;;  %v642_v45 = vpop.permute.xlu1 %641 }
 0x12a   : > { %v710_v33 = vsel %vm709_vm2, %v708_v32, %v703_v31  ;;  %v644_v46 = vadd.f32 %v642_v45, %v633_v17 }
 0x12b   : > { %v712_v36 = vsel %vm711_vm3, %v710_v33, %v706_v34  ;;  %v1384_v33 = vld [vmem:[%s1773_s16 + $0x8] sm:$0xff]  ;;  %v1383_v34 = vld [vmem:[%s1773_s16] sm:$0xff] }
 0x12c   : > { %v678_v47 = vpack.c.bf16 %v644_v46, %v644_v46  ;;  %1022 = vmatpush.bf16.msra.mxu2 %v1384_v33  ;;  %v993_v46 = vperm.slane %v1800_v13, 6 }
 0x130   : > { %1023 = vmatpush.bf16.msra.mxu2 %v1383_v34 }
 0x134   : > { %v674_v35 = vpop.f32.mrf.mxu2 }
 0x135   : > { %v713_v37 = vmul.f32 %v712_v36, %v674_v35 }
 0x137   : > { %v714_v38 = vpack.c.bf16 %v713_v37, %v713_v37 }
 0x139   : > { %787 = vmatmul.bf16.vlgmr.msrb.gmra.mxu0 %v714_v38 }
 0x13c   : > { %v676_v39 = vpop.f32.mrf.mxu2 }
 0x1b6   : > { %v788_v41 = vpop.f32.mrf.mxu0 }
 0x1b7   : > { %v792_v42 = vmul.f32 0.35355338, %v788_v41 }
 0x1b9   : > { %v794_v43 = vsel %vm793_vm4, %v792_v42, -inf }
 0x1ba   : > { %795 = vmax.xlane.f32.xlu2 %v794_v43 }
 0x1be   : > { %v790_v44 = vpop.f32.mrf.mxu0 }
 0x1bf   : > { %v991_v44 = vperm.slane %v1800_v13, 5 }
 0x1d2   : > { %680 = vrot.lane.b32.xlu2 %v678_v47, %s1623_s24 }
 0x22d   : > { %v796_v54 = vpop.xlane.xlu2 %795 }
 0x22e   : > { %v797_v56 = vsub.f32 %v792_v42, %v796_v54 }
 0x230   : > { %v798_v57 = vmul.f32 1.442695, %v797_v56 }
 0x232   : > { %1454 = vpow2.f32 %v798_v57 }
 0x235   : > { %v681_v59 = vpop.permute.xlu2 %680 }
 0x236   : > { %1254 = vmatmul.msk.bf16.vlgmr.msra.gmra.mxu3 %vm588_vm1, %v681_v59 }
 0x238   : > { %v1455_v60 = vpop.eup %1454 }
 0x239   : > { %v800_v61 = vpack.c.bf16 %v1455_v60, %v1455_v60 }
 0x23b   : > { %1291 = vmatmul.msk.bf16.vlgmr.msrb.gmra.mxu1 %vm793_vm4, %v800_v61  ;;  %1296 = vmatmul.msk.bf16.vlgmr.msrb.gmra.mxu2 %vm793_vm4, %v800_v61 }
 0x2b8   : > { %v821_v1 = vpop.f32.mrf.mxu1 }
 0x2b9   : > { %v694_v2 = vpop.f32.mrf.mxu3 }
 0x2ba   : > { %v846_v3 = vmul.f32 %v821_v1, %v694_v2 }
 0x2bc   : > { %v847_v4 = vpack.c.bf16 %v846_v3, %v846_v3 }
 0x2be   : > { %v842_v6 = vpop.f32.mrf.mxu2  ;;  %920 = vmatmul.bf16.vlgmr.msrb.gmra.mxu3 %v847_v4 }
 0x2bf   : > { %1456 = vrcp.f32 %v842_v6 }
 0x2c0   : > { %v823_v7 = vpop.f32.mrf.mxu1  ;;  %1458 = vrcp.f32 %v1626_v22 }
 0x2c1   : > { %v696_v8 = vpop.f32.mrf.mxu3 }
 0x2c2   : > { %v1052_v8 = vperm.slane %v1800_v13, 7 }
 0x2c5   : > { %v1457_v10 = vpop.eup %1456 }
 0x2c6   : > { %v844_v9 = vpop.f32.mrf.mxu2  ;;  %v1459_v23 = vpop.eup %1458 }
 0x2c7   : > { %v966_v24 = vmul.f32 32.0, %v1459_v23  ;;  %vm970_vm5 = vweird.f32 %v1459_v23 }
 0x2c9   : > { %v967_v25 = vsub.f32 1.0, %v966_v24 }
 0x2cb   : > { %v968_v26 = vmul.f32 %v1459_v23, %v967_v25 }
 0x2cd   : > { %v969_v27 = vadd.f32 %v1459_v23, %v968_v26 }
 0x2cf   : > { %v971_v28 = vsel %vm970_vm5, %v1459_v23, %v969_v27 }
 0x341   : > { %v921_v11 = vpop.f32.mrf.mxu3 }
 0x342   : > { %v926_v12 = vmul.f32 %v1457_v10, %v921_v11  ;;  %v1453_v10 = vld [vmem:[%s1778_s0 + $0x8] ss:$0 sm:$0xff] }
 0x344   : > { %v927_v14 = vpack.c.bf16 %v926_v12, %v926_v12 }
 0x346   : > { %1337 = vmatmul.msk.bf16.vlgmr.msra.gmra.mxu1 %vm588_vm1, %v927_v14 }
 0x349   : > { %v923_v15 = vpop.f32.mrf.mxu3 }
 0x3c3   : > { %v957_v17 = vpop.f32.mrf.mxu1 }
 0x3c4   : > { %v958_v18 = vadd.f32 %v957_v17, %v932_v16 }
 0x3c6   : > { %v961_v19 = vadd.f32 %v958_v18, %v1781_v5 }
 0x3c8   : > { %v962_v20 = vsel %vm588_vm1, %v961_v19, 0.0 }
 0x3c9   : > { %963 = vadd.xlane.f32.xlu0 %v962_v20 }
 0x3cb   : > { %v959_v21 = vpop.f32.mrf.mxu1 }
 0x43c   : > { %v964_v29 = vpop.xlane.xlu0 %963 }
 0x43d   : > { %v972_v30 = vmul.f32 %v971_v28, %v964_v29 }
 0x43f   : > { %v973_v31 = vsub.f32 %v961_v19, %v972_v30 }
 0x441   : > { %v974_v32 = vmul.f32 %v973_v31, %v973_v31 }
 0x443   : > { %v975_v5 = vsel %vm588_vm1, %v974_v32, 0.0 }
 0x444   : > { %976 = vadd.xlane.f32.xlu1 %v975_v5 }
 0x4b7   : > { %v977_v35 = vpop.xlane.xlu1 %976 }
 0x4b8   : > { %v978_v36 = vmul.f32 %v977_v35, %v971_v28 }
 0x4ba   : > { %v979_v37 = vadd.f32 1e-05, %v978_v36 }
 0x4bc   : > { %1460 = vrsqrt.f32 %v979_v37  ;;  %vm986_vm7 = vweird.f32 %v979_v37 }
 0x4c2   : > { %v1461_v38 = vpop.eup %1460 }
 0x4c3   : > { %v981_v39 = vmul.f32 %v1461_v38, %v979_v37  ;;  %vm987_vm6 = vweird.f32 %v1461_v38 }
 0x4c4   : > { %vm988_vm8 = vmor %vm986_vm7, %vm987_vm6 }
 0x4c5   : > { %v982_v40 = vmul.f32 %v1461_v38, %v981_v39 }
 0x4c7   : > { %v983_v41 = vmul.f32 0.5, %v982_v40 }
 0x4c9   : > { %v984_v42 = vsub.f32 1.5, %v983_v41 }
 0x4cb   : > { %v985_v43 = vmul.f32 %v1461_v38, %v984_v42 }
 0x4cd   : > { %v989_v45 = vsel %vm988_vm8, %v1461_v38, %v985_v43 }
 0x4ce   : > { %v990_v47 = vmul.f32 %v989_v45, %v973_v31 }
 0x4d0   : > { %v992_v48 = vmul.f32 %v991_v44, %v990_v47 }
 0x4d2   : > { %v994_v49 = vadd.f32 %v993_v46, %v992_v48 }
 0x4d4   : > { %v995_v50 = vpack.c.bf16 %v994_v49, %v994_v49 }
 0x4d6   : > { %1346 = vmatmul.msk.bf16.vlgmr.msra.gmra.mxu2 %vm588_vm1, %v995_v50 }
 0x559   : > { %v1025_v52 = vpop.f32.mrf.mxu2 }
 0x55a   : > { %v1026_v53 = vadd.f32 %v1025_v52, %v1000_v51 }
 0x55c   : > { %v1029_v54 = vadd.f32 %v1026_v53, %v994_v49 }
 0x55e   : > { %v1030_v55 = vsel %vm588_vm1, %v1029_v54, 0.0 }
 0x55f   : > { %1031 = vadd.xlane.f32.xlu2 %v1030_v55 }
 0x561   : > { %v1027_v56 = vpop.f32.mrf.mxu2 }
 0x5d2   : > { %v1032_v57 = vpop.xlane.xlu2 %1031 }
 0x5d3   : > { %v1033_v58 = vmul.f32 %v1032_v57, %v971_v28 }
 0x5d5   : > { %v1034_v59 = vsub.f32 %v1029_v54, %v1033_v58 }
 0x5d7   : > { %v1035_v60 = vmul.f32 %v1034_v59, %v1034_v59 }
 0x5d9   : > { %v1036_v61 = vsel %vm588_vm1, %v1035_v60, 0.0 }
 0x5da   : > { %1037 = vadd.xlane.f32.xlu0 %v1036_v61 }
 0x64d   : > { %v1038_v62 = vpop.xlane.xlu0 %1037 }
 0x64e   : > { %v1039_v63 = vmul.f32 %v1038_v62, %v971_v28 }
 0x650   : > { %v1040_v0 = vadd.f32 1e-05, %v1039_v63 }
 0x652   : > { %1462 = vrsqrt.f32 %v1040_v0  ;;  %vm1047_vm10 = vweird.f32 %v1040_v0 }
 0x658   : > { %v1463_v1 = vpop.eup %1462 }
 0x659   : > { %v1042_v2 = vmul.f32 %v1463_v1, %v1040_v0  ;;  %vm1048_vm9 = vweird.f32 %v1463_v1 }
 0x65a   : > { %vm1049_vm11 = vmor %vm1047_vm10, %vm1048_vm9 }
 0x65b   : > { %v1043_v3 = vmul.f32 %v1463_v1, %v1042_v2 }
 0x65d   : > { %v1044_v4 = vmul.f32 0.5, %v1043_v3 }
 0x65f   : > { %v1045_v6 = vsub.f32 1.5, %v1044_v4 }
 0x661   : > { %v1046_v7 = vmul.f32 %v1463_v1, %v1045_v6 }
 0x663   : > { %v1050_v9 = vsel %vm1049_vm11, %v1463_v1, %v1046_v7 }
 0x664   : > { %v1051_v11 = vmul.f32 %v1050_v9, %v1034_v59 }
 0x666   : > { %v1053_v12 = vmul.f32 %v1052_v8, %v1051_v11  ;;  %1060 = sbr.rel (%p1347_p9) target bundleno = 1644 (0x66c), region = 88 }
 0x668   : > { %v1055_v14 = vadd.f32 %v1453_v10, %v1053_v12 }
 0x66a   : > { %1056 = vst.msk [vmem:[#allocation2] sm:$0xff] %vm588_vm1, %v1055_v14 }
 0x66b   : > { %1061 = vst.msk [vmem:[#allocation9] sm:$0xff] %vm588_vm1, %v1055_v14 }
 0x66c PF: > { %s1913_s25 = sadd.s32 4294967295, %s1616_s23   ;;  %s1072_s14 = sshll.u32 %s1904_s12, 4  ;;  %s1073_s14 = int_to_ptr.hbm [resolvable:$true] %s1072_s14 }
 0x66d   : > { %p1417_p10 = scmp.eq.s32.totalorder %s1913_s25, 2  ;;  %s1627_s18 = smov [#allocation9]  }
 0x66e   : > { %s1070_s0 = sshll.u32 %s1627_s18, 4  ;;  %s1071_s0 = int_to_ptr.vmem [resolvable:$true] %s1070_s0 }
 0x66f   : > { %1398 = dma.vmem_to_hbm [thread:$0]  (%p1417_p10), %s1071_s0, 128, %s1073_s14, [#allocation5]  }
 0x670   : > { %1603 = dma.done.wait (%p1417_p10), [#allocation5], 128  }
 0x671   : > { %1605 = vsyncadd (%p1417_p10), [#allocation5], 4294967168 }
 0x672 PF: > { %s25_s23 = sadd.s32 1, %s1616_s23   ;;  %s1914_s21 = smov %s1612_s22 }
 0x673   : > { %p22_p11 = scmp.ge.s32.totalorder %s25_s23, 5   ;;  %s1915_s22 = smov %s1917_s15 }
 0x675   :  { %24 = sbr.rel (!%p22_p11) target bundleno = 7 (0x7), region = 131 }
 0x67a   :  { %1086 = vsyncpa [#allocation4], 1 }
 0x67b   :  { %1088 = vsyncpa [#allocation4 + $0x1], 1 }
 0x67c   :  { %1089 = vsyncpa [#allocation7], 1 }
 0x67d   :  { %1090 = vsyncpa [#allocation5], 1 }
 0x67e   :  { %1092 = vsyncpa [#allocation5 + $0x1], 1 }

</bundles_post_ra>
